<compile_context>
chip_gen: v7x
topology: tpu7x:2x2x1
jax: 0.10.0
libtpu: 0.0.40
codegen_flags: <defaults>
</compile_context>

<pallas_src>
import jax
import jax.numpy as jnp
from jax.experimental import pallas as pl
from jax.experimental.pallas import tpu as pltpu


# ----------------------------------------------------------------------------
# Kernel body (shared by the batch-grid and batch-folded paths).
# ----------------------------------------------------------------------------
def _amrgcn_kernel(x_ref, a_ref, w_in_ref, w2_ref, w3_ref, a_ln_ref,
                   wfin_ref, vecs_ref, out_ref):
    """Row layout is n-major: row = node (or (batch, node) when folded).

    x_ref    : (R, T*F_in)            bf16, columns ordered (t, f)
    a_ref    : (R, R)                 bf16 adjacency (exact (N,N), or
                                      kron(I_B, adj) when the batch is folded)
    w_in_ref : (T*F_in, T*G1 + T*C)   bf16 = [kron(I_T,w1) | kron(I_T,w_res)]
    w2_ref   : (T*G1, T*G2)           bf16 block-diagonal over T
    w3_ref   : (T*G2, T*C)            bf16 block-diagonal over T
    a_ln_ref : (T*C, T*C)             f32 block-averaging matrix kron(I_T, 1/C)
    wfin_ref : (T*C, P_pad)           bf16 final conv weight, lane-padded
    vecs_ref : (4, T*C)               f32 rows = [b3+b_res, gamma, beta, b_fin]
    out_ref  : (R, P_pad)             f32
    """
    f32 = jnp.float32
    bf16 = jnp.bfloat16

    x = x_ref[...]                      # (R, T*F_in) bf16
    a = a_ref[...]                      # (R, R)      bf16
    tg1 = w2_ref.shape[0]               # T*G1

    # ---- fused input transform: x @ [W1_blk | Wres_blk] ---------------------
    xw = jnp.dot(x, w_in_ref[...], preferred_element_type=f32)   # (R, TG1+TC)
    xw1 = xw[:, :tg1]                                            # (R, T*G1)
    res = xw[:, tg1:]                                            # (R, T*C)

    # ---- AutoEncoder stand-in: 2-layer GCN + linear head --------------------
    # layer 1 (re-associated): relu(adj @ (x @ W1))
    h1 = jnp.maximum(
        jnp.dot(a, xw1.astype(bf16), preferred_element_type=f32), 0.0)
    # layer 2: relu((adj @ h1) @ W2)
    ah1 = jnp.dot(a, h1.astype(bf16), preferred_element_type=f32)
    h2 = jnp.maximum(
        jnp.dot(ah1.astype(bf16), w2_ref[...], preferred_element_type=f32), 0.0)
    # head: h2 @ W3                                               (R, T*C)
    ae = jnp.dot(h2.astype(bf16), w3_ref[...], preferred_element_type=f32)

    bias = vecs_ref[0:1, :]             # b3 + b_res, tiled over T
    gamma = vecs_ref[1:2, :]
    beta = vecs_ref[2:3, :]

    # ---- residual + relu + LayerNorm over each C-block (f32) ----------------
    s = jnp.maximum(res + ae + bias, 0.0)                          # (R, T*C)
    mu = jnp.dot(s, a_ln_ref[...], preferred_element_type=f32)     # per-block mean
    d = s - mu
    var = jnp.dot(d * d, a_ln_ref[...], preferred_element_type=f32)
    ln = d * jax.lax.rsqrt(var + 1e-5) * gamma + beta              # (R, T*C)

    # ---- final conv, one matmul over the (t, c) lanes -----------------------
    p_pad = out_ref.shape[-1]
    bfin = vecs_ref[3:4, :p_pad]
    out = jnp.dot(ln.astype(bf16), wfin_ref[...],
                  preferred_element_type=f32) + bfin               # (R, P_pad)
    out_ref[...] = out.astype(out_ref.dtype)


# ----------------------------------------------------------------------------
# Parameter pre-baking (runs once, not per forward call).
# ----------------------------------------------------------------------------
def prepare_params(params):
    bf16, f32 = jnp.bfloat16, jnp.float32
    w1, w2, w3 = params["w1"], params["w2"], params["w3"]
    w_res, w_final = params["w_res"], params["w_final"]     # (T, C, P)
    T, C, P = w_final.shape
    P_pad = 128
    assert P <= P_pad, "pre_len must be <= 128 for the lane-padded output"
    TC = T * C
    assert TC >= P_pad, "packed-vector layout assumes T*C >= 128"

    eye_t = jnp.eye(T, dtype=f32)
    # fused first-layer weight: [kron(I_T, w1) | kron(I_T, w_res)]
    w_in = jnp.concatenate(
        [jnp.kron(eye_t, w1), jnp.kron(eye_t, w_res)], axis=1).astype(bf16)
    w2_blk = jnp.kron(eye_t, w2).astype(bf16)                # (T*G1, T*G2)
    w3_blk = jnp.kron(eye_t, w3).astype(bf16)                # (T*G2, T*C)
    # block-averaging matrix for the per-(n, t) LayerNorm over C lanes
    a_ln = jnp.kron(eye_t, jnp.full((C, C), 1.0 / C, f32))   # (T*C, T*C)
    # final conv weight (T, C, P) -> (T*C, P) padded to 128 lanes
    w_fin = jnp.zeros((TC, P_pad), f32).at[:, :P].set(
        w_final.reshape(TC, P)).astype(bf16)
    # packed per-channel vectors
    vecs = jnp.zeros((4, TC), f32)
    vecs = vecs.at[0].set(jnp.tile((params["b3"] + params["b_res"]).reshape(-1), T))
    vecs = vecs.at[1].set(jnp.tile(params["ln_gamma"].reshape(-1), T))
    vecs = vecs.at[2].set(jnp.tile(params["ln_beta"].reshape(-1), T))
    vecs = vecs.at[3, :P_pad].set(
        jnp.zeros((P_pad,), f32).at[:P].set(params["b_final"].reshape(-1)))
    return {"w_in": w_in, "w2_blk": w2_blk, "w3_blk": w3_blk, "a_ln": a_ln,
            "w_fin": w_fin, "vecs": vecs, "pre_len": int(P)}


def _has_multiple_tensorcores():
    # v7x has 2 TensorCores per chip -> keep a batch-parallel grid there.
    # Single-TC v5e/v6e -> fold the batch into the matmul rows (one grid step).
    try:
        kind = jax.devices()[0].device_kind.lower()
    except Exception:
        return False
    return "v7" in kind


# ----------------------------------------------------------------------------
# Wrapper.
# ----------------------------------------------------------------------------
def amrgcn_forward(x, adj, prep, batch_grid=None):
    """x: (B, N, T, F_in), adj: (N, N) -> pred: (B, N, pre_len, 1)."""
    B, N, T, F_in = x.shape
    TF = T * F_in
    P_pad = prep["w_fin"].shape[1]
    P = prep["pre_len"]
    bf16 = jnp.bfloat16

    if batch_grid is None:
        batch_grid = _has_multiple_tensorcores()

    # per-call preprocessing is only what depends on runtime inputs
    x_nm = x.reshape(B, N, TF).astype(bf16)      # n-major rows, (t, f) lanes
    adj_b = adj.astype(bf16)

    weights = (prep["w_in"], prep["w2_blk"], prep["w3_blk"], prep["a_ln"],
               prep["w_fin"], prep["vecs"])
    const2 = lambda *_: (0, 0)
    w_specs = [pl.BlockSpec(w.shape, const2) for w in weights]

    if batch_grid:
        # one batch element per grid step; adjacency/weights stay resident
        # (constant index_map -> fetched once, not re-DMA'd per step).
        out = pl.pallas_call(
            _amrgcn_kernel,
            out_shape=jax.ShapeDtypeStruct((B, N, P_pad), jnp.float32),
            grid=(B,),
            in_specs=[pl.BlockSpec((None, N, TF), lambda b: (b, 0, 0)),
                      pl.BlockSpec((N, N), const2)] + w_specs,
            out_specs=pl.BlockSpec((None, N, P_pad), lambda b: (b, 0, 0)),
            compiler_params=pltpu.CompilerParams(
                dimension_semantics=("parallel",)),
        )(x_nm, adj_b, *weights)
        pred = out
    else:
        # batch folded into the matmul row dimension: single grid step.
        x_rows = x_nm.reshape(B * N, TF)
        adj_blk = jnp.kron(jnp.eye(B, dtype=jnp.float32), adj).astype(bf16)
        out = pl.pallas_call(
            _amrgcn_kernel,
            out_shape=jax.ShapeDtypeStruct((B * N, P_pad), jnp.float32),
            grid=(1,),
            in_specs=[pl.BlockSpec((B * N, TF), const2),
                      pl.BlockSpec((B * N, B * N), const2)] + w_specs,
            out_specs=pl.BlockSpec((B * N, P_pad), const2),
            compiler_params=pltpu.CompilerParams(
                dimension_semantics=("arbitrary",)),
        )(x_rows, adj_blk, *weights)
        pred = out.reshape(B, N, P_pad)

    return pred[:, :, :P][..., None]             # (B, N, pre_len, 1)


# ----------------------------------------------------------------------------
# Pure-JAX reference (same bf16-operand / f32-accumulate math, re-associated
# first GCN layer like the kernel).
# ----------------------------------------------------------------------------
def amrgcn_reference(x, adj, params):
    bf16, f32 = jnp.bfloat16, jnp.float32
    xb = x.astype(bf16)                                  # (B, N, T, F_in)
    adj_b = adj.astype(bf16)
    w1, w2, w3 = (params["w1"].astype(bf16), params["w2"].astype(bf16),
                  params["w3"].astype(bf16))
    wres = params["w_res"].astype(bf16)
    wf = params["w_final"].astype(bf16)

    xw1 = jnp.einsum("bntf,fg->bntg", xb, w1, preferred_element_type=f32)
    h1 = jax.nn.relu(jnp.einsum("nm,bmtg->bntg", adj_b, xw1.astype(bf16),
                                preferred_element_type=f32))
    ah1 = jnp.einsum("nm,bmtg->bntg", adj_b, h1.astype(bf16),
                     preferred_element_type=f32)
    h2 = jax.nn.relu(jnp.einsum("bntg,gh->bnth", ah1.astype(bf16), w2,
                                preferred_element_type=f32))
    ae = jnp.einsum("bnth,hc->bntc", h2.astype(bf16), w3,
                    preferred_element_type=f32) + params["b3"]
    res = jnp.einsum("bntf,fc->bntc", xb, wres,
                     preferred_element_type=f32) + params["b_res"]
    s = jax.nn.relu(res + ae)
    mu = jnp.mean(s, -1, keepdims=True)
    var = jnp.mean((s - mu) ** 2, -1, keepdims=True)
    ln = (s - mu) * jax.lax.rsqrt(var + 1e-5) * params["ln_gamma"] + params["ln_beta"]
    out = jnp.einsum("bntc,tcp->bnp", ln.astype(bf16), wf,
                     preferred_element_type=f32) + params["b_final"]
    return out[..., None]


def init_params(key, F_in, G1, G2, C, T, P):
    ks = jax.random.split(key, 8)
    scale = 0.1
    return {
        "w1": scale * jax.random.normal(ks[0], (F_in, G1), jnp.float32),
        "w2": scale * jax.random.normal(ks[1], (G1, G2), jnp.float32),
        "w3": scale * jax.random.normal(ks[2], (G2, C), jnp.float32),
        "b3": scale * jax.random.normal(ks[3], (1, C), jnp.float32),
        "w_res": scale * jax.random.normal(ks[4], (F_in, C), jnp.float32),
        "b_res": scale * jax.random.normal(ks[5], (1, C), jnp.float32),
        "ln_gamma": jnp.ones((1, C), jnp.float32),
        "ln_beta": jnp.zeros((1, C), jnp.float32),
        # final conv weight stored pre-transposed to (T, C, pre_len)
        "w_final": scale * jax.random.normal(ks[6], (T, C, P), jnp.float32),
        "b_final": scale * jax.random.normal(ks[7], (1, P), jnp.float32),
    }


if __name__ == "__main__":
    B, N, T, F_in = 2, 16, 8, 4
    G1, G2, C, P = 32, 32, 32, 4   # gcn1_out, gcn2_out, nb_time_filter, pre_len

    key = jax.random.PRNGKey(0)
    kx, kadj, kp = jax.random.split(key, 3)
    x = jax.random.normal(kx, (B, N, T, F_in), jnp.float32)
    adj_raw = jax.random.uniform(kadj, (N, N), jnp.float32)
    adj = adj_raw / jnp.sum(adj_raw, axis=-1, keepdims=True)   # row-normalized
    params = init_params(kp, F_in, G1, G2, C, T, P)
    prep = prepare_params(params)                              # pre-baked once

    ref = amrgcn_reference(x, adj, params)

    # validate both execution structures (single-TC fold and v7x batch-grid);
    # the device-dependent default picks one of these two.
    fwd_fold = jax.jit(lambda xx, aa: amrgcn_forward(xx, aa, prep, batch_grid=False))
    fwd_bgrid = jax.jit(lambda xx, aa: amrgcn_forward(xx, aa, prep, batch_grid=True))
    for name, fn in (("fold", fwd_fold), ("batch_grid", fwd_bgrid)):
        pred = jax.block_until_ready(fn(x, adj))
        assert pred.shape == (B, N, P, 1), (name, pred.shape)
        err = float(jnp.max(jnp.abs(pred - ref)))
        assert jnp.allclose(pred, ref, atol=1e-2, rtol=1e-2), (
            name + " mismatch vs reference, max abs diff = " + str(err))

    print("KERNEL_OK")
</pallas_src>

<mosaic_0001>
module attributes {stable_mosaic.version = 11 : i64} {
  func.func @_amrgcn_kernel(%arg0: i32, %arg1: memref<32x32xbf16, #tpu.memory_space<vmem>>, %arg2: memref<32x32xbf16, #tpu.memory_space<vmem>>, %arg3: memref<32x512xbf16, #tpu.memory_space<vmem>>, %arg4: memref<256x256xbf16, #tpu.memory_space<vmem>>, %arg5: memref<256x256xbf16, #tpu.memory_space<vmem>>, %arg6: memref<256x256xf32, #tpu.memory_space<vmem>>, %arg7: memref<256x128xbf16, #tpu.memory_space<vmem>>, %arg8: memref<4x256xf32, #tpu.memory_space<vmem>>, %arg9: memref<32x128xf32, #tpu.memory_space<vmem>>) attributes {dimension_semantics = [#tpu.dimension_semantics<arbitrary>], iteration_bounds = array<i64: 1>, scalar_prefetch = 0 : i64, scratch_operands = 0 : i64, tpu.core_type = #tpu.core_type<tc>, window_params = [{pipeline_mode = #tpu.pipeline_mode<synchronous>, transform_indices = @transform_0, window_bounds = array<i64: 32, 32>}, {pipeline_mode = #tpu.pipeline_mode<synchronous>, transform_indices = @transform_1, window_bounds = array<i64: 32, 32>}, {pipeline_mode = #tpu.pipeline_mode<synchronous>, transform_indices = @transform_2, window_bounds = array<i64: 32, 512>}, {pipeline_mode = #tpu.pipeline_mode<synchronous>, transform_indices = @transform_3, window_bounds = array<i64: 256, 256>}, {pipeline_mode = #tpu.pipeline_mode<synchronous>, transform_indices = @transform_4, window_bounds = array<i64: 256, 256>}, {pipeline_mode = #tpu.pipeline_mode<synchronous>, transform_indices = @transform_5, window_bounds = array<i64: 256, 256>}, {pipeline_mode = #tpu.pipeline_mode<synchronous>, transform_indices = @transform_6, window_bounds = array<i64: 256, 128>}, {pipeline_mode = #tpu.pipeline_mode<synchronous>, transform_indices = @transform_7, window_bounds = array<i64: 4, 256>}, {pipeline_mode = #tpu.pipeline_mode<synchronous>, transform_indices = @transform_8, window_bounds = array<i64: 32, 128>}]} {
    %c0 = arith.constant 0 : index
    %c0_0 = arith.constant 0 : index
    %0 = vector.load %arg1[%c0, %c0_0] : memref<32x32xbf16, #tpu.memory_space<vmem>>, vector<32x32xbf16>
    %c0_1 = arith.constant 0 : index
    %c0_2 = arith.constant 0 : index
    %1 = vector.load %arg2[%c0_1, %c0_2] : memref<32x32xbf16, #tpu.memory_space<vmem>>, vector<32x32xbf16>
    %c0_3 = arith.constant 0 : index
    %c0_4 = arith.constant 0 : index
    %2 = vector.load %arg3[%c0_3, %c0_4] : memref<32x512xbf16, #tpu.memory_space<vmem>>, vector<32x512xbf16>
    %cst = arith.constant dense<0.000000e+00> : vector<32x512xf32>
    %3 = tpu.matmul %0, %2, %cst {dimension_numbers = #tpu.dot_dimension_numbers<[1], [0], [0], [1], [0, 0, 1, 1], [], []>} : vector<32x32xbf16>, vector<32x512xbf16>, vector<32x512xf32> -> vector<32x512xf32>
    %4 = vector.extract_strided_slice %3 {offsets = [0, 0], sizes = [32, 256], strides = [1, 1]} : vector<32x512xf32> to vector<32x256xf32>
    %5 = vector.extract_strided_slice %3 {offsets = [0, 256], sizes = [32, 256], strides = [1, 1]} : vector<32x512xf32> to vector<32x256xf32>
    %6 = arith.truncf %4 : vector<32x256xf32> to vector<32x256xbf16>
    %cst_5 = arith.constant dense<0.000000e+00> : vector<32x256xf32>
    %7 = tpu.matmul %1, %6, %cst_5 {dimension_numbers = #tpu.dot_dimension_numbers<[1], [0], [0], [1], [0, 0, 1, 1], [], []>} : vector<32x32xbf16>, vector<32x256xbf16>, vector<32x256xf32> -> vector<32x256xf32>
    %cst_6 = arith.constant 0.000000e+00 : f32
    %8 = vector.broadcast %cst_6 : f32 to vector<32x256xf32>
    %9 = arith.maximumf %7, %8 : vector<32x256xf32>
    %10 = arith.truncf %9 : vector<32x256xf32> to vector<32x256xbf16>
    %cst_7 = arith.constant dense<0.000000e+00> : vector<32x256xf32>
    %11 = tpu.matmul %1, %10, %cst_7 {dimension_numbers = #tpu.dot_dimension_numbers<[1], [0], [0], [1], [0, 0, 1, 1], [], []>} : vector<32x32xbf16>, vector<32x256xbf16>, vector<32x256xf32> -> vector<32x256xf32>
    %12 = arith.truncf %11 : vector<32x256xf32> to vector<32x256xbf16>
    %c0_8 = arith.constant 0 : index
    %c0_9 = arith.constant 0 : index
    %13 = vector.load %arg4[%c0_8, %c0_9] : memref<256x256xbf16, #tpu.memory_space<vmem>>, vector<256x256xbf16>
    %cst_10 = arith.constant dense<0.000000e+00> : vector<32x256xf32>
    %14 = tpu.matmul %12, %13, %cst_10 {dimension_numbers = #tpu.dot_dimension_numbers<[1], [0], [0], [1], [0, 0, 1, 1], [], []>} : vector<32x256xbf16>, vector<256x256xbf16>, vector<32x256xf32> -> vector<32x256xf32>
    %cst_11 = arith.constant 0.000000e+00 : f32
    %15 = vector.broadcast %cst_11 : f32 to vector<32x256xf32>
    %16 = arith.maximumf %14, %15 : vector<32x256xf32>
    %17 = arith.truncf %16 : vector<32x256xf32> to vector<32x256xbf16>
    %c0_12 = arith.constant 0 : index
    %c0_13 = arith.constant 0 : index
    %18 = vector.load %arg5[%c0_12, %c0_13] : memref<256x256xbf16, #tpu.memory_space<vmem>>, vector<256x256xbf16>
    %cst_14 = arith.constant dense<0.000000e+00> : vector<32x256xf32>
    %19 = tpu.matmul %17, %18, %cst_14 {dimension_numbers = #tpu.dot_dimension_numbers<[1], [0], [0], [1], [0, 0, 1, 1], [], []>} : vector<32x256xbf16>, vector<256x256xbf16>, vector<32x256xf32> -> vector<32x256xf32>
    %c0_15 = arith.constant 0 : index
    %c0_16 = arith.constant 0 : index
    %20 = vector.load %arg8[%c0_15, %c0_16] : memref<4x256xf32, #tpu.memory_space<vmem>>, vector<1x256xf32>
    %c1 = arith.constant 1 : index
    %c0_17 = arith.constant 0 : index
    %21 = vector.load %arg8[%c1, %c0_17] : memref<4x256xf32, #tpu.memory_space<vmem>>, vector<1x256xf32>
    %c2 = arith.constant 2 : index
    %c0_18 = arith.constant 0 : index
    %22 = vector.load %arg8[%c2, %c0_18] : memref<4x256xf32, #tpu.memory_space<vmem>>, vector<1x256xf32>
    %23 = arith.addf %5, %19 : vector<32x256xf32>
    %24 = vector.broadcast %20 : vector<1x256xf32> to vector<32x256xf32>
    %25 = arith.addf %23, %24 : vector<32x256xf32>
    %cst_19 = arith.constant 0.000000e+00 : f32
    %26 = vector.broadcast %cst_19 : f32 to vector<32x256xf32>
    %27 = arith.maximumf %25, %26 : vector<32x256xf32>
    %c0_20 = arith.constant 0 : index
    %c0_21 = arith.constant 0 : index
    %28 = vector.load %arg6[%c0_20, %c0_21] : memref<256x256xf32, #tpu.memory_space<vmem>>, vector<256x256xf32>
    %cst_22 = arith.constant dense<0.000000e+00> : vector<32x256xf32>
    %29 = tpu.matmul %27, %28, %cst_22 {dimension_numbers = #tpu.dot_dimension_numbers<[1], [0], [0], [1], [0, 0, 1, 1], [], []>} : vector<32x256xf32>, vector<256x256xf32>, vector<32x256xf32> -> vector<32x256xf32>
    %30 = arith.subf %27, %29 : vector<32x256xf32>
    %31 = arith.mulf %30, %30 : vector<32x256xf32>
    %c0_23 = arith.constant 0 : index
    %c0_24 = arith.constant 0 : index
    %32 = vector.load %arg6[%c0_23, %c0_24] : memref<256x256xf32, #tpu.memory_space<vmem>>, vector<256x256xf32>
    %cst_25 = arith.constant dense<0.000000e+00> : vector<32x256xf32>
    %33 = tpu.matmul %31, %32, %cst_25 {dimension_numbers = #tpu.dot_dimension_numbers<[1], [0], [0], [1], [0, 0, 1, 1], [], []>} : vector<32x256xf32>, vector<256x256xf32>, vector<32x256xf32> -> vector<32x256xf32>
    %cst_26 = arith.constant 9.99999974E-6 : f32
    %34 = vector.broadcast %cst_26 : f32 to vector<32x256xf32>
    %35 = arith.addf %33, %34 : vector<32x256xf32>
    %36 = math.rsqrt %35 : vector<32x256xf32>
    %37 = arith.mulf %30, %36 : vector<32x256xf32>
    %38 = vector.broadcast %21 : vector<1x256xf32> to vector<32x256xf32>
    %39 = arith.mulf %37, %38 : vector<32x256xf32>
    %40 = vector.broadcast %22 : vector<1x256xf32> to vector<32x256xf32>
    %41 = arith.addf %39, %40 : vector<32x256xf32>
    %c3 = arith.constant 3 : index
    %c0_27 = arith.constant 0 : index
    %42 = vector.load %arg8[%c3, %c0_27] : memref<4x256xf32, #tpu.memory_space<vmem>>, vector<1x128xf32>
    %43 = arith.truncf %41 : vector<32x256xf32> to vector<32x256xbf16>
    %c0_28 = arith.constant 0 : index
    %c0_29 = arith.constant 0 : index
    %44 = vector.load %arg7[%c0_28, %c0_29] : memref<256x128xbf16, #tpu.memory_space<vmem>>, vector<256x128xbf16>
    %cst_30 = arith.constant dense<0.000000e+00> : vector<32x128xf32>
    %45 = tpu.matmul %43, %44, %cst_30 {dimension_numbers = #tpu.dot_dimension_numbers<[1], [0], [0], [1], [0, 0, 1, 1], [], []>} : vector<32x256xbf16>, vector<256x128xbf16>, vector<32x128xf32> -> vector<32x128xf32>
    %46 = vector.broadcast %42 : vector<1x128xf32> to vector<32x128xf32>
    %47 = arith.addf %45, %46 : vector<32x128xf32>
    %c0_31 = arith.constant 0 : index
    %c0_32 = arith.constant 0 : index
    %48 = vector.load %arg9[%c0_31, %c0_32] : memref<32x128xf32, #tpu.memory_space<vmem>>, vector<32x128xf32>
    tpu.vector_store %arg9[%c0_31, %c0_32], %47 {strides = array<i32>} : memref<32x128xf32, #tpu.memory_space<vmem>>, vector<32x128xf32>,
    return
  }
  func.func @transform_0(%arg0: i32) -> (i32, i32) {
    %c0_i32 = arith.constant 0 : i32
    %c0_i32_0 = arith.constant 0 : i32
    %c0_i32_1 = arith.constant 0 : i32
    return %c0_i32, %c0_i32_0 : i32, i32
  }
  func.func @transform_1(%arg0: i32) -> (i32, i32) {
    %c0_i32 = arith.constant 0 : i32
    %c0_i32_0 = arith.constant 0 : i32
    %c0_i32_1 = arith.constant 0 : i32
    return %c0_i32, %c0_i32_0 : i32, i32
  }
  func.func @transform_2(%arg0: i32) -> (i32, i32) {
    %c0_i32 = arith.constant 0 : i32
    %c0_i32_0 = arith.constant 0 : i32
    %c0_i32_1 = arith.constant 0 : i32
    return %c0_i32, %c0_i32_0 : i32, i32
  }
  func.func @transform_3(%arg0: i32) -> (i32, i32) {
    %c0_i32 = arith.constant 0 : i32
    %c0_i32_0 = arith.constant 0 : i32
    %c0_i32_1 = arith.constant 0 : i32
    return %c0_i32, %c0_i32_0 : i32, i32
  }
  func.func @transform_4(%arg0: i32) -> (i32, i32) {
    %c0_i32 = arith.constant 0 : i32
    %c0_i32_0 = arith.constant 0 : i32
    %c0_i32_1 = arith.constant 0 : i32
    return %c0_i32, %c0_i32_0 : i32, i32
  }
  func.func @transform_5(%arg0: i32) -> (i32, i32) {
    %c0_i32 = arith.constant 0 : i32
    %c0_i32_0 = arith.constant 0 : i32
    %c0_i32_1 = arith.constant 0 : i32
    return %c0_i32, %c0_i32_0 : i32, i32
  }
  func.func @transform_6(%arg0: i32) -> (i32, i32) {
    %c0_i32 = arith.constant 0 : i32
    %c0_i32_0 = arith.constant 0 : i32
    %c0_i32_1 = arith.constant 0 : i32
    return %c0_i32, %c0_i32_0 : i32, i32
  }
  func.func @transform_7(%arg0: i32) -> (i32, i32) {
    %c0_i32 = arith.constant 0 : i32
    %c0_i32_0 = arith.constant 0 : i32
    %c0_i32_1 = arith.constant 0 : i32
    return %c0_i32, %c0_i32_0 : i32, i32
  }
  func.func @transform_8(%arg0: i32) -> (i32, i32) {
    %c0_i32 = arith.constant 0 : i32
    %c0_i32_0 = arith.constant 0 : i32
    %c0_i32_1 = arith.constant 0 : i32
    return %c0_i32, %c0_i32_0 : i32, i32
  }
}

</mosaic_0001>

<bundles_post_ra>
// kernel: _lambda_.1
= control target key start
LH: loop header
LB: loop body
LE: loop exit
PB: predicated region body
PF: predicated region fallthrough
CT: control target
= control target key end

     0   :  { %v1811_v1 = vmov 0   ;;  %vm96_vm0 = vcmask 261120   ;;  %s2519_s2 = inlined_call_operand.vmem [shape: bf16[32,512], index: 2, kind: input, shape index: {}]   ;;  %s2520_s0 = inlined_call_operand.vmem [shape: bf16[32,32], index: 0, kind: input, shape index: {}]   ;;  %s2521_s1 = inlined_call_operand.vmem [shape: bf16[32,32], index: 1, kind: input, shape index: {}]   ;;  %s2522_s3 = inlined_call_operand.vmem [shape: bf16[256,256], index: 3, kind: input, shape index: {}]   ;;  %s2523_s4 = inlined_call_operand.vmem [shape: bf16[256,256], index: 4, kind: input, shape index: {}]   ;;  %s2524_s5 = inlined_call_operand.vmem [shape: f32[256,256], index: 5, kind: input, shape index: {}]   ;;  %s2525_s7 = inlined_call_operand.vmem [shape: f32[4,256], index: 7, kind: input, shape index: {}]   ;;  %s2526_s6 = inlined_call_operand.vmem [shape: bf16[256,128], index: 6, kind: input, shape index: {}]   ;;  %s2527_s8 = inlined_call_operand.vmem [shape: f32[32,128], index: 8, kind: output, shape index: {}]  }
   0x1   :  { %v1667_v0 = vld [vmem:[%s2519_s2 + $0x4] ss:$16 sps:$4 sm:$0xff]   ;;  %135 = vmatprep.mubr.bf16.mxu1 %v1811_v1  ;;  %261 = vmatprep.mubr.bf16.mxu0 %v1811_v1  ;;  %v1669_v2 = vld [vmem:[%s2519_s2] ss:$16 sps:$4 sm:$0xff]   ;;  %v1674_v6 = vld [vmem:[%s2520_s0 + $0x8] sm:$0xff]  }
   0x2   :  { %103 = vmatprep.subr.bf16.mxu1 %v1667_v0  ;;  %v1670_v3 = vld [vmem:[%s2519_s2 + $0x24] ss:$16 sps:$4 sm:$0xff]   ;;  %v1672_v4 = vld [vmem:[%s2519_s2 + $0x20] ss:$16 sps:$4 sm:$0xff]   ;;  %v1677_v7 = vld [vmem:[%s2519_s2 + $0x8] ss:$16 sps:$4 sm:$0xff]  }
   0x3   :  { %104 = vmatpush1.bf16.msra.mxu1 %v1669_v2  ;;  %v1673_v5 = vld [vmem:[%s2520_s0] sm:$0xff]   ;;  %v1679_v8 = vld [vmem:[%s2519_s2 + $0xc] ss:$16 sps:$4 sm:$0xff]   ;;  %v1680_v10 = vld [vmem:[%s2519_s2 + $0x28] ss:$16 sps:$4 sm:$0xff]  }
   0x4   :  { %105 = vmatprep.subr.bf16.mxu1 %v1670_v3  ;;  %v1682_v9 = vld [vmem:[%s2519_s2 + $0x2c] ss:$16 sps:$4 sm:$0xff]   ;;  %v1900_v23 = vld [vmem:[%s2521_s1] sm:$0xff]   ;;  %v1686_v28 = vld [vmem:[%s2522_s3 + $0x10] ss:$8 sps:$4 sm:$0xff]  }
   0x5   :  { %v1908_v24 = vld [vmem:[%s2521_s1 + $0x8] sm:$0xff]   ;;  %v1688_v27 = vld [vmem:[%s2522_s3 + $0x14] ss:$8 sps:$4 sm:$0xff]   ;;  %v1692_v32 = vld [vmem:[%s2522_s3 + $0x30] ss:$8 sps:$4 sm:$0xff]  }
   0x6   :  { %v1683_v25 = vld [vmem:[%s2522_s3] ss:$8 sps:$4 sm:$0xff]   ;;  %v1685_v26 = vld [vmem:[%s2522_s3 + $0x4] ss:$8 sps:$4 sm:$0xff]   ;;  %v1694_v31 = vld [vmem:[%s2522_s3 + $0x34] ss:$8 sps:$4 sm:$0xff]  }
   0x7   :  { %106 = vmatpush1.bf16.msra.mxu1 %v1672_v4  ;;  %v1691_v29 = vld [vmem:[%s2522_s3 + $0x24] ss:$8 sps:$4 sm:$0xff]   ;;  %v1689_v30 = vld [vmem:[%s2522_s3 + $0x20] ss:$8 sps:$4 sm:$0xff]   ;;  %v1700_v35 = vld [vmem:[%s2522_s3 + $0x54] ss:$8 sps:$4 sm:$0xff]  }
   0x8   :  { %156 = vmatprep.subr.bf16.mxu1 %v1679_v8  ;;  %v1697_v33 = vld [vmem:[%s2522_s3 + $0x44] ss:$8 sps:$4 sm:$0xff]   ;;  %v1695_v34 = vld [vmem:[%s2522_s3 + $0x40] ss:$8 sps:$4 sm:$0xff]   ;;  %v1698_v36 = vld [vmem:[%s2522_s3 + $0x50] ss:$8 sps:$4 sm:$0xff]  }
   0x9   :  { %v1703_v37 = vld [vmem:[%s2522_s3 + $0x64] ss:$8 sps:$4 sm:$0xff]   ;;  %v1701_v38 = vld [vmem:[%s2522_s3 + $0x60] ss:$8 sps:$4 sm:$0xff]   ;;  %v1706_v39 = vld [vmem:[%s2522_s3 + $0x74] ss:$8 sps:$4 sm:$0xff]  }
   0xa   :  { %1409 = vmatmul.mubr.msk.bf16.vlgmr.msra.gmra.mrb[0].mxu1 %vm96_vm0, %v1673_v5  ;;  %v1704_v40 = vld [vmem:[%s2522_s3 + $0x70] ss:$8 sps:$4 sm:$0xff]   ;;  %v1709_v41 = vld [vmem:[%s2522_s3 + $0x84] ss:$8 sps:$4 sm:$0xff]   ;;  %v1707_v42 = vld [vmem:[%s2522_s3 + $0x80] ss:$8 sps:$4 sm:$0xff]  }
   0xb   :  { %145 = vmatprep.mubr.bf16.mxu1 %v1811_v1  ;;  %157 = vmatpush1.bf16.msra.mxu1 %v1677_v7  ;;  %v1712_v43 = vld [vmem:[%s2522_s3 + $0x94] ss:$8 sps:$4 sm:$0xff]   ;;  %v1710_v44 = vld [vmem:[%s2522_s3 + $0x90] ss:$8 sps:$4 sm:$0xff]   ;;  %v1715_v45 = vld [vmem:[%s2522_s3 + $0xa4] ss:$8 sps:$4 sm:$0xff]  }
   0xc   :  { %158 = vmatprep.subr.bf16.mxu1 %v1682_v9  ;;  %v1713_v46 = vld [vmem:[%s2522_s3 + $0xa0] ss:$8 sps:$4 sm:$0xff]   ;;  %v1718_v47 = vld [vmem:[%s2522_s3 + $0xb4] ss:$8 sps:$4 sm:$0xff]   ;;  %v1716_v48 = vld [vmem:[%s2522_s3 + $0xb0] ss:$8 sps:$4 sm:$0xff]  }
   0xd   :  { %v1721_v49 = vld [vmem:[%s2522_s3 + $0xc4] ss:$8 sps:$4 sm:$0xff]   ;;  %v1719_v50 = vld [vmem:[%s2522_s3 + $0xc0] ss:$8 sps:$4 sm:$0xff]   ;;  %v1724_v51 = vld [vmem:[%s2522_s3 + $0xd4] ss:$8 sps:$4 sm:$0xff]  }
   0xe   :  { %v1722_v52 = vld [vmem:[%s2522_s3 + $0xd0] ss:$8 sps:$4 sm:$0xff]   ;;  %v1727_v53 = vld [vmem:[%s2522_s3 + $0xe4] ss:$8 sps:$4 sm:$0xff]   ;;  %v1725_v54 = vld [vmem:[%s2522_s3 + $0xe0] ss:$8 sps:$4 sm:$0xff]  }
   0xf   :  { %159 = vmatpush1.bf16.msra.mxu1 %v1680_v10 }
  0x12   :  { %1410 = vmatmul.mubr.msk.bf16.gmra.mrb[4].mxu1 %vm96_vm0, %v1674_v6 }
  0x13   :  { %188 = vmatprep.mubr.bf16.mxu1 %v1811_v1 }
  0x1a   :  { %1411 = vmatmul.mubr.msk.bf16.vlgmr.msra.gmra.mrb[8].mxu1 %vm96_vm0, %v1673_v5 }
  0x1b   :  { %198 = vmatprep.mubr.bf16.mxu1 %v1811_v1 }
  0x22   :  { %1412 = vmatmul.mubr.msk.bf16.gmra.mrb[12].mxu1 %vm96_vm0, %v1674_v6 }
  0x23   :  { %326 = vmatprep.mubr.bf16.mxu1 %v1811_v1 }
  0xdd   :  { %v137_v11 = vpop.f32.mrb[0].mxu1 }
  0xde   :  { %v139_v12 = vpop.f32.mrb[1].mxu1 }
  0xdf   :  { %v141_v13 = vpop.f32.mrb[2].mxu1 }
  0xe0   :  { %v209_v14 = vpack.c.bf16 %v141_v13, %v137_v11  ;;  %v143_v15 = vpop.f32.mrb[3].mxu1  ;;  %v1728_v13 = vld [vmem:[%s2522_s3 + $0xf0] ss:$8 sps:$4 sm:$0xff]  }
  0xe1   :  { %v210_v16 = vpack.c.bf16 %v143_v15, %v139_v12  ;;  %v1730_v12 = vld [vmem:[%s2522_s3 + $0xf4] ss:$8 sps:$4 sm:$0xff]  }
  0xe2   :  { %v1736_v15 = vld [vmem:[%s2523_s4 + $0x14] ss:$8 sps:$4 sm:$0xff]  }
  0xe3   :  { %229 = vmatprep.subr.bf16.mxu0 %v210_v16  ;;  %v1734_v16 = vld [vmem:[%s2523_s4 + $0x10] ss:$8 sps:$4 sm:$0xff]  }
  0xe4   :  { %230 = vmatpush1.bf16.msra.mxu0 %v209_v14  ;;  %v1731_v14 = vld [vmem:[%s2523_s4] ss:$8 sps:$4 sm:$0xff]  }
  0xe5   :  { %v147_v17 = vpop.f32.mrb[4].mxu1 }
  0xe6   :  { %v149_v18 = vpop.f32.mrb[5].mxu1 }
  0xe7   :  { %v151_v19 = vpop.f32.mrb[6].mxu1 }
  0xe8   :  { %v211_v20 = vpack.c.bf16 %v151_v19, %v147_v17  ;;  %v153_v21 = vpop.f32.mrb[7].mxu1  ;;  %v1739_v17 = vld [vmem:[%s2523_s4 + $0x24] ss:$8 sps:$4 sm:$0xff]   ;;  %v1742_v19 = vld [vmem:[%s2523_s4 + $0x34] ss:$8 sps:$4 sm:$0xff]  }
  0xe9   :  { %v212_v22 = vpack.c.bf16 %v153_v21, %v149_v18  ;;  %v1737_v18 = vld [vmem:[%s2523_s4 + $0x20] ss:$8 sps:$4 sm:$0xff]   ;;  %v1745_v21 = vld [vmem:[%s2523_s4 + $0x44] ss:$8 sps:$4 sm:$0xff]  }
  0xeb   :  { %231 = vmatprep.subr.bf16.mxu0 %v212_v22  ;;  %v1743_v22 = vld [vmem:[%s2523_s4 + $0x40] ss:$8 sps:$4 sm:$0xff]  }
  0xec   :  { %232 = vmatpush1.bf16.msra.mxu0 %v211_v20  ;;  %v1740_v20 = vld [vmem:[%s2523_s4 + $0x30] ss:$8 sps:$4 sm:$0xff]  }
  0xed   :  { %543 = vmatprep.subr.bf16.mxu0 %v1685_v26  ;;  %v1749_v26 = vld [vmem:[%s2523_s4 + $0x60] ss:$8 sps:$4 sm:$0xff]  }
  0xef   :  { %1415 = vmatmul.mubr.msk.bf16.vlgmr.msra.gmra.mrb[0].mxu0 %vm96_vm0, %v1900_v23 }
  0xf0   :  { %271 = vmatprep.mubr.bf16.mxu0 %v1811_v1  ;;  %544 = vmatpush1.bf16.msra.mxu0 %v1683_v25  ;;  %v1751_v25 = vld [vmem:[%s2523_s4 + $0x64] ss:$8 sps:$4 sm:$0xff]  }
  0xf1   :  { %545 = vmatprep.subr.bf16.mxu0 %v1688_v27  ;;  %v1754_v27 = vld [vmem:[%s2523_s4 + $0x74] ss:$8 sps:$4 sm:$0xff]  }
  0xf4   :  { %546 = vmatpush1.bf16.msra.mxu0 %v1686_v28  ;;  %v1752_v28 = vld [vmem:[%s2523_s4 + $0x70] ss:$8 sps:$4 sm:$0xff]  }
  0xf5   :  { %547 = vmatprep.subr.bf16.mxu0 %v1691_v29  ;;  %v1757_v29 = vld [vmem:[%s2523_s4 + $0x84] ss:$8 sps:$4 sm:$0xff]  }
  0xf7   :  { %1416 = vmatmul.mubr.msk.bf16.gmra.mrb[4].mxu0 %vm96_vm0, %v1908_v24 }
  0xf8   :  { %548 = vmatpush1.bf16.msra.mxu0 %v1689_v30  ;;  %v1755_v30 = vld [vmem:[%s2523_s4 + $0x80] ss:$8 sps:$4 sm:$0xff]  }
  0xf9   :  { %549 = vmatprep.subr.bf16.mxu0 %v1694_v31  ;;  %v1760_v31 = vld [vmem:[%s2523_s4 + $0x94] ss:$8 sps:$4 sm:$0xff]  }
  0xfc   :  { %550 = vmatpush1.bf16.msra.mxu0 %v1692_v32  ;;  %v1758_v32 = vld [vmem:[%s2523_s4 + $0x90] ss:$8 sps:$4 sm:$0xff]  }
  0xfd   :  { %551 = vmatprep.subr.bf16.mxu0 %v1697_v33  ;;  %v1763_v33 = vld [vmem:[%s2523_s4 + $0xa4] ss:$8 sps:$4 sm:$0xff]  }
 0x100   :  { %552 = vmatpush1.bf16.msra.mxu0 %v1695_v34  ;;  %v1761_v34 = vld [vmem:[%s2523_s4 + $0xa0] ss:$8 sps:$4 sm:$0xff]  }
 0x101   :  { %553 = vmatprep.subr.bf16.mxu0 %v1700_v35  ;;  %v1766_v35 = vld [vmem:[%s2523_s4 + $0xb4] ss:$8 sps:$4 sm:$0xff]  }
 0x104   :  { %554 = vmatpush1.bf16.msra.mxu0 %v1698_v36  ;;  %v1764_v36 = vld [vmem:[%s2523_s4 + $0xb0] ss:$8 sps:$4 sm:$0xff]  }
 0x105   :  { %555 = vmatprep.subr.bf16.mxu0 %v1703_v37  ;;  %v1769_v37 = vld [vmem:[%s2523_s4 + $0xc4] ss:$8 sps:$4 sm:$0xff]  }
 0x108   :  { %556 = vmatpush1.bf16.msra.mxu0 %v1701_v38  ;;  %v1767_v38 = vld [vmem:[%s2523_s4 + $0xc0] ss:$8 sps:$4 sm:$0xff]  }
 0x109   :  { %557 = vmatprep.subr.bf16.mxu0 %v1706_v39  ;;  %v1772_v39 = vld [vmem:[%s2523_s4 + $0xd4] ss:$8 sps:$4 sm:$0xff]  }
 0x10c   :  { %558 = vmatpush1.bf16.msra.mxu0 %v1704_v40  ;;  %v1770_v40 = vld [vmem:[%s2523_s4 + $0xd0] ss:$8 sps:$4 sm:$0xff]  }
 0x10d   :  { %559 = vmatprep.subr.bf16.mxu0 %v1709_v41 }
 0x110   :  { %560 = vmatpush1.bf16.msra.mxu0 %v1707_v42 }
 0x111   :  { %561 = vmatprep.subr.bf16.mxu0 %v1712_v43 }
 0x114   :  { %562 = vmatpush1.bf16.msra.mxu0 %v1710_v44 }
 0x115   :  { %563 = vmatprep.subr.bf16.mxu0 %v1715_v45 }
 0x118   :  { %564 = vmatpush1.bf16.msra.mxu0 %v1713_v46 }
 0x119   :  { %565 = vmatprep.subr.bf16.mxu0 %v1718_v47 }
 0x11c   :  { %566 = vmatpush1.bf16.msra.mxu0 %v1716_v48 }
 0x11d   :  { %567 = vmatprep.subr.bf16.mxu0 %v1721_v49 }
 0x120   :  { %568 = vmatpush1.bf16.msra.mxu0 %v1719_v50 }
 0x121   :  { %569 = vmatprep.subr.bf16.mxu0 %v1724_v51 }
 0x124   :  { %570 = vmatpush1.bf16.msra.mxu0 %v1722_v52 }
 0x125   :  { %571 = vmatprep.subr.bf16.mxu0 %v1727_v53  ;;  %v1775_v53 = vld [vmem:[%s2523_s4 + $0xe4] ss:$8 sps:$4 sm:$0xff]  }
 0x128   :  { %572 = vmatpush1.bf16.msra.mxu0 %v1725_v54  ;;  %v1773_v54 = vld [vmem:[%s2523_s4 + $0xe0] ss:$8 sps:$4 sm:$0xff]  }
 0x129   :  { %573 = vmatprep.subr.bf16.mxu0 %v1730_v12  ;;  %v908_v12 = vld [vmem:[%s2524_s5 + $0x78] sm:$0xff] }
 0x12c   :  { %574 = vmatpush1.bf16.msra.mxu0 %v1728_v13 }
 0x1c2   :  { %v263_v55 = vpop.f32.mrb[0].mxu0 }
 0x1c3   :  { %v265_v56 = vpop.f32.mrb[1].mxu0  ;;  %v282_v58 = vmax.f32 %v263_v55, 0.0  ;;  %v1778_v55 = vld [vmem:[%s2523_s4 + $0xf4] ss:$8 sps:$4 sm:$0xff]  }
 0x1c4   :  { %v267_v57 = vpop.f32.mrb[2].mxu0  ;;  %v283_v61 = vmax.f32 %v265_v56, 0.0  ;;  %v1776_v56 = vld [vmem:[%s2523_s4 + $0xf0] ss:$8 sps:$4 sm:$0xff]  }
 0x1c5   :  { %v284_v59 = vmax.f32 %v267_v57, 0.0  ;;  %v269_v60 = vpop.f32.mrb[3].mxu0  ;;  %v894_v57 = vld [vmem:[%s2524_s5 + $0x8] sm:$0xff] }
 0x1c6   :  { %v285_v62 = vmax.f32 %v269_v60, 0.0 }
 0x1c7   :  { %v290_v63 = vpack.c.bf16 %v284_v59, %v282_v58  ;;  %v896_v58 = vld [vmem:[%s2524_s5 + $0x18] sm:$0xff]  ;;  %v893_v59 = vld [vmem:[%s2524_s5] sm:$0xff] }
 0x1c8   :  { %v291_v0 = vpack.c.bf16 %v285_v62, %v283_v61  ;;  %v1530_v60 = vpack.c.bf16 %v896_v58, %v894_v57  ;;  %v895_v61 = vld [vmem:[%s2524_s5 + $0x10] sm:$0xff]  ;;  %v898_v62 = vld [vmem:[%s2524_s5 + $0x28] sm:$0xff] }
 0x1c9   :  { %v935_v57 = vld [vmem:[%s2524_s5 + $0x150] sm:$0xff]  ;;  %v938_v58 = vld [vmem:[%s2524_s5 + $0x168] sm:$0xff] }
 0x1ca   :  { %v273_v2 = vpop.f32.mrb[4].mxu0  ;;  %294 = vmatprep.subr.bf16.mxu1 %v291_v0  ;;  %v2127_v0 = vpack.c.bf16 %v895_v61, %v893_v59  ;;  %1531 = vmatprep.subr.bf16.mxu0 %v1530_v60  ;;  %v940_v59 = vld [vmem:[%s2524_s5 + $0x178] sm:$0xff] }
 0x1cb   :  { %v275_v3 = vpop.f32.mrb[5].mxu0  ;;  %295 = vmatpush1.bf16.msra.mxu1 %v290_v63  ;;  %v286_v5 = vmax.f32 %v273_v2, 0.0  ;;  %v900_v63 = vld [vmem:[%s2524_s5 + $0x38] sm:$0xff]  ;;  %v2309_v61 = vpack.c.bf16 %v940_v59, %v938_v58 }
 0x1cc   :  { %v277_v4 = vpop.f32.mrb[6].mxu0  ;;  %v287_v8 = vmax.f32 %v275_v3, 0.0  ;;  %v2129_v2 = vpack.c.bf16 %v900_v63, %v898_v62  ;;  %v897_v3 = vld [vmem:[%s2524_s5 + $0x20] sm:$0xff]  ;;  %v939_v63 = vld [vmem:[%s2524_s5 + $0x170] sm:$0xff] }
 0x1cd   :  { %v288_v6 = vmax.f32 %v277_v4, 0.0  ;;  %v279_v7 = vpop.f32.mrb[7].mxu0  ;;  %v899_v4 = vld [vmem:[%s2524_s5 + $0x30] sm:$0xff]  ;;  %v937_v62 = vld [vmem:[%s2524_s5 + $0x160] sm:$0xff] }
 0x1ce   :  { %v289_v9 = vmax.f32 %v279_v7, 0.0  ;;  %v2144_v7 = vpack.c.bf16 %v899_v4, %v897_v3  ;;  %v942_v3 = vld [vmem:[%s2524_s5 + $0x188] sm:$0xff]  ;;  %v944_v4 = vld [vmem:[%s2524_s5 + $0x198] sm:$0xff] }
 0x1cf   :  { %v292_v10 = vpack.c.bf16 %v288_v6, %v286_v5  ;;  %v902_v5 = vld [vmem:[%s2524_s5 + $0x48] sm:$0xff]  ;;  %v904_v6 = vld [vmem:[%s2524_s5 + $0x58] sm:$0xff] }
 0x1d0   :  { %v293_v11 = vpack.c.bf16 %v289_v9, %v287_v8  ;;  %v2147_v8 = vpack.c.bf16 %v904_v6, %v902_v5  ;;  %v901_v9 = vld [vmem:[%s2524_s5 + $0x40] sm:$0xff]  ;;  %v2324_v5 = vpack.c.bf16 %v939_v63, %v937_v62  ;;  %v2327_v6 = vpack.c.bf16 %v944_v4, %v942_v3 }
 0x1d2   :  { %296 = vmatprep.subr.bf16.mxu1 %v293_v11  ;;  %v906_v11 = vld [vmem:[%s2524_s5 + $0x68] sm:$0xff] }
 0x1d3   :  { %297 = vmatpush1.bf16.msra.mxu1 %v292_v10  ;;  %v903_v10 = vld [vmem:[%s2524_s5 + $0x50] sm:$0xff] }
 0x1d4   :  { %v2162_v13 = vpack.c.bf16 %v903_v10, %v901_v9  ;;  %v941_v9 = vld [vmem:[%s2524_s5 + $0x180] sm:$0xff]  ;;  %v943_v10 = vld [vmem:[%s2524_s5 + $0x190] sm:$0xff] }
 0x1d6   :  { %1417 = vmatmul.mubr.msk.bf16.vlgmr.msra.gmra.mrb[16].mxu1 %vm96_vm0, %v1900_v23  ;;  %v1748_v23 = vld [vmem:[%s2523_s4 + $0x54] ss:$8 sps:$4 sm:$0xff]  }
 0x1d7   :  { %336 = vmatprep.mubr.bf16.mxu1 %v1811_v1  ;;  %v1733_v1 = vld [vmem:[%s2523_s4 + $0x4] ss:$8 sps:$4 sm:$0xff]  }
 0x1d8   :  { %800 = vmatprep.subr.bf16.mxu1 %v1733_v1  ;;  %v905_v1 = vld [vmem:[%s2524_s5 + $0x60] sm:$0xff] }
 0x1d9   :  { %801 = vmatpush1.bf16.msra.mxu1 %v1731_v14  ;;  %v2165_v14 = vpack.c.bf16 %v908_v12, %v906_v11  ;;  %v946_v11 = vld [vmem:[%s2524_s5 + $0x1a8] sm:$0xff]  ;;  %v948_v12 = vld [vmem:[%s2524_s5 + $0x1b8] sm:$0xff] }
 0x1da   :  { %802 = vmatprep.subr.bf16.mxu1 %v1736_v15  ;;  %v907_v15 = vld [vmem:[%s2524_s5 + $0x70] sm:$0xff] }
 0x1dd   :  { %803 = vmatpush1.bf16.msra.mxu1 %v1734_v16  ;;  %v910_v16 = vld [vmem:[%s2524_s5 + $0x88] sm:$0xff] }
 0x1de   :  { %1418 = vmatmul.mubr.msk.bf16.gmra.mrb[20].mxu1 %vm96_vm0, %v1908_v24  ;;  %804 = vmatprep.subr.bf16.mxu1 %v1739_v17  ;;  %v1746_v24 = vld [vmem:[%s2523_s4 + $0x50] ss:$8 sps:$4 sm:$0xff]  }
 0x1df   :  { %v912_v17 = vld [vmem:[%s2524_s5 + $0x98] sm:$0xff] }
 0x1e1   :  { %805 = vmatpush1.bf16.msra.mxu1 %v1737_v18  ;;  %v2180_v18 = vpack.c.bf16 %v907_v15, %v905_v1  ;;  %v1580_v1 = vpack.c.bf16 %v943_v10, %v941_v9  ;;  %v1582_v15 = vpack.c.bf16 %v948_v12, %v946_v11 }
 0x1e2   :  { %806 = vmatprep.subr.bf16.mxu1 %v1742_v19  ;;  %v2183_v19 = vpack.c.bf16 %v912_v17, %v910_v16  ;;  %v945_v16 = vld [vmem:[%s2524_s5 + $0x1a0] sm:$0xff]  ;;  %v947_v17 = vld [vmem:[%s2524_s5 + $0x1b0] sm:$0xff] }
 0x1e5   :  { %807 = vmatpush1.bf16.msra.mxu1 %v1740_v20  ;;  %v909_v20 = vld [vmem:[%s2524_s5 + $0x80] sm:$0xff] }
 0x1e6   :  { %808 = vmatprep.subr.bf16.mxu1 %v1745_v21  ;;  %v911_v21 = vld [vmem:[%s2524_s5 + $0x90] sm:$0xff] }
 0x1e9   :  { %809 = vmatpush1.bf16.msra.mxu1 %v1743_v22  ;;  %v914_v22 = vld [vmem:[%s2524_s5 + $0xa8] sm:$0xff] }
 0x1ea   :  { %810 = vmatprep.subr.bf16.mxu1 %v1748_v23  ;;  %v916_v23 = vld [vmem:[%s2524_s5 + $0xb8] sm:$0xff] }
 0x1ed   :  { %811 = vmatpush1.bf16.msra.mxu1 %v1746_v24  ;;  %v2198_v24 = vpack.c.bf16 %v911_v21, %v909_v20  ;;  %v950_v20 = vld [vmem:[%s2524_s5 + $0x1c8] sm:$0xff]  ;;  %v952_v21 = vld [vmem:[%s2524_s5 + $0x1d8] sm:$0xff] }
 0x1ee   :  { %812 = vmatprep.subr.bf16.mxu1 %v1751_v25  ;;  %v2201_v25 = vpack.c.bf16 %v916_v23, %v914_v22  ;;  %v1584_v22 = vpack.c.bf16 %v947_v17, %v945_v16  ;;  %v1586_v23 = vpack.c.bf16 %v952_v21, %v950_v20  ;;  %v1779_v20 = vld [vmem:[%s2526_s6 + $0x40] sm:$0xff]  }
 0x1ef   :  { %v1780_v21 = vld [vmem:[%s2526_s6] sm:$0xff]  }
 0x1f1   :  { %813 = vmatpush1.bf16.msra.mxu1 %v1749_v26  ;;  %v913_v26 = vld [vmem:[%s2524_s5 + $0xa0] sm:$0xff] }
 0x1f2   :  { %814 = vmatprep.subr.bf16.mxu1 %v1754_v27  ;;  %v915_v27 = vld [vmem:[%s2524_s5 + $0xb0] sm:$0xff] }
 0x1f5   :  { %815 = vmatpush1.bf16.msra.mxu1 %v1752_v28  ;;  %v918_v28 = vld [vmem:[%s2524_s5 + $0xc8] sm:$0xff] }
 0x1f6   :  { %816 = vmatprep.subr.bf16.mxu1 %v1757_v29  ;;  %v920_v29 = vld [vmem:[%s2524_s5 + $0xd8] sm:$0xff] }
 0x1f9   :  { %817 = vmatpush1.bf16.msra.mxu1 %v1755_v30  ;;  %v2216_v30 = vpack.c.bf16 %v915_v27, %v913_v26 }
 0x1fa   :  { %818 = vmatprep.subr.bf16.mxu1 %v1760_v31  ;;  %v2219_v31 = vpack.c.bf16 %v920_v29, %v918_v28 }
 0x1fd   :  { %819 = vmatpush1.bf16.msra.mxu1 %v1758_v32  ;;  %v917_v32 = vld [vmem:[%s2524_s5 + $0xc0] sm:$0xff] }
 0x1fe   :  { %820 = vmatprep.subr.bf16.mxu1 %v1763_v33  ;;  %v919_v33 = vld [vmem:[%s2524_s5 + $0xd0] sm:$0xff] }
 0x201   :  { %821 = vmatpush1.bf16.msra.mxu1 %v1761_v34  ;;  %v922_v34 = vld [vmem:[%s2524_s5 + $0xe8] sm:$0xff] }
 0x202   :  { %822 = vmatprep.subr.bf16.mxu1 %v1766_v35  ;;  %v924_v35 = vld [vmem:[%s2524_s5 + $0xf8] sm:$0xff] }
 0x205   :  { %823 = vmatpush1.bf16.msra.mxu1 %v1764_v36  ;;  %v2234_v36 = vpack.c.bf16 %v919_v33, %v917_v32 }
 0x206   :  { %824 = vmatprep.subr.bf16.mxu1 %v1769_v37  ;;  %v2237_v37 = vpack.c.bf16 %v924_v35, %v922_v34 }
 0x209   :  { %825 = vmatpush1.bf16.msra.mxu1 %v1767_v38  ;;  %v921_v38 = vld [vmem:[%s2524_s5 + $0xe0] sm:$0xff] }
 0x20a   :  { %826 = vmatprep.subr.bf16.mxu1 %v1772_v39  ;;  %v923_v39 = vld [vmem:[%s2524_s5 + $0xf0] sm:$0xff] }
 0x20d   :  { %827 = vmatpush1.bf16.msra.mxu1 %v1770_v40  ;;  %v926_v40 = vld [vmem:[%s2524_s5 + $0x108] sm:$0xff] }
 0x20e   :  { %828 = vmatprep.subr.bf16.mxu1 %v1775_v53  ;;  %v936_v53 = vld [vmem:[%s2524_s5 + $0x158] sm:$0xff] }
 0x211   :  { %829 = vmatpush1.bf16.msra.mxu1 %v1773_v54 }
 0x212   :  { %830 = vmatprep.subr.bf16.mxu1 %v1778_v55 }
 0x215   :  { %831 = vmatpush1.bf16.msra.mxu1 %v1776_v56  ;;  %v933_v56 = vld [vmem:[%s2524_s5 + $0x140] sm:$0xff] }
 0x216   :  { %1595 = vmatprep.subr.bf16.mxu1 %v1530_v60  ;;  %v2306_v60 = vpack.c.bf16 %v935_v57, %v933_v56 }
 0x2a9   :  { %v328_v41 = vpop.f32.mrb[16].mxu1 }
 0x2aa   :  { %v330_v42 = vpop.f32.mrb[17].mxu1 }
 0x2ab   :  { %v332_v43 = vpop.f32.mrb[18].mxu1 }
 0x2ac   :  { %v347_v44 = vpack.c.bf16 %v332_v43, %v328_v41  ;;  %v334_v45 = vpop.f32.mrb[19].mxu1  ;;  %v928_v41 = vld [vmem:[%s2524_s5 + $0x118] sm:$0xff] }
 0x2ad   :  { %v348_v46 = vpack.c.bf16 %v334_v45, %v330_v42  ;;  %v2252_v42 = vpack.c.bf16 %v923_v39, %v921_v38  ;;  %v2255_v43 = vpack.c.bf16 %v928_v41, %v926_v40  ;;  %v927_v45 = vld [vmem:[%s2524_s5 + $0x110] sm:$0xff] }
 0x2af   :  { %575 = vmatprep.mubr.bf16.mxu0 %v348_v46  ;;  %v930_v46 = vld [vmem:[%s2524_s5 + $0x128] sm:$0xff] }
 0x2b0   :  { %576 = vmatmul.mubr.bf16.vlgmr.msra.gmra.mrb[8].mxu0 %v347_v44  ;;  %v925_v44 = vld [vmem:[%s2524_s5 + $0x100] sm:$0xff] }
 0x2b1   :  { %v338_v47 = vpop.f32.mrb[20].mxu1  ;;  %1533 = vmatpush1.bf16.msra.mxu0 %v2127_v0 }
 0x2b2   :  { %v340_v48 = vpop.f32.mrb[21].mxu1  ;;  %1535 = vmatprep.subr.bf16.mxu0 %v2129_v2 }
 0x2b3   :  { %v342_v49 = vpop.f32.mrb[22].mxu1 }
 0x2b4   :  { %v349_v50 = vpack.c.bf16 %v342_v49, %v338_v47  ;;  %v344_v51 = vpop.f32.mrb[23].mxu1  ;;  %v932_v47 = vld [vmem:[%s2524_s5 + $0x138] sm:$0xff] }
 0x2b5   :  { %v350_v52 = vpack.c.bf16 %v344_v51, %v340_v48  ;;  %1537 = vmatpush1.bf16.msra.mxu0 %v2144_v7  ;;  %v2270_v48 = vpack.c.bf16 %v927_v45, %v925_v44  ;;  %v2273_v49 = vpack.c.bf16 %v932_v47, %v930_v46  ;;  %v931_v51 = vld [vmem:[%s2524_s5 + $0x130] sm:$0xff] }
 0x2b6   :  { %1539 = vmatprep.subr.bf16.mxu0 %v2147_v8 }
 0x2b7   :  { %585 = vmatprep.mubr.bf16.mxu0 %v350_v52  ;;  %v934_v52 = vld [vmem:[%s2524_s5 + $0x148] sm:$0xff] }
 0x2b8   :  { %586 = vmatmul.mubr.bf16.gmra.mrb[12].mxu0 %v349_v50  ;;  %v929_v50 = vld [vmem:[%s2524_s5 + $0x120] sm:$0xff]  ;;  %v2291_v55 = vpack.c.bf16 %v936_v53, %v934_v52 }
 0x2b9   :  { %1541 = vmatpush1.bf16.msra.mxu0 %v2162_v13  ;;  %v2288_v54 = vpack.c.bf16 %v931_v51, %v929_v50 }
 0x2ba   :  { %1543 = vmatprep.subr.bf16.mxu0 %v2165_v14 }
 0x2bd   :  { %1545 = vmatpush1.bf16.msra.mxu0 %v2180_v18 }
 0x2be   :  { %1547 = vmatprep.subr.bf16.mxu0 %v2183_v19 }
 0x2c1   :  { %1549 = vmatpush1.bf16.msra.mxu0 %v2198_v24 }
 0x2c2   :  { %1551 = vmatprep.subr.bf16.mxu0 %v2201_v25 }
 0x2c5   :  { %1553 = vmatpush1.bf16.msra.mxu0 %v2216_v30 }
 0x2c6   :  { %1555 = vmatprep.subr.bf16.mxu0 %v2219_v31 }
 0x2c9   :  { %1557 = vmatpush1.bf16.msra.mxu0 %v2234_v36 }
 0x2ca   :  { %1559 = vmatprep.subr.bf16.mxu0 %v2237_v37 }
 0x2cd   :  { %1561 = vmatpush1.bf16.msra.mxu0 %v2252_v42 }
 0x2ce   :  { %1563 = vmatprep.subr.bf16.mxu0 %v2255_v43 }
 0x2d1   :  { %1565 = vmatpush1.bf16.msra.mxu0 %v2270_v48 }
 0x2d2   :  { %1567 = vmatprep.subr.bf16.mxu0 %v2273_v49 }
 0x2d5   :  { %1569 = vmatpush1.bf16.msra.mxu0 %v2288_v54 }
 0x2d6   :  { %1571 = vmatprep.subr.bf16.mxu0 %v2291_v55 }
 0x2d9   :  { %1573 = vmatpush1.bf16.msra.mxu0 %v2306_v60 }
 0x2da   :  { %1575 = vmatprep.subr.bf16.mxu0 %v2309_v61 }
 0x2dd   :  { %1577 = vmatpush1.bf16.msra.mxu0 %v2324_v5 }
 0x2de   :  { %1579 = vmatprep.subr.bf16.mxu0 %v2327_v6 }
 0x2e1   :  { %1581 = vmatpush1.bf16.msra.mxu0 %v1580_v1 }
 0x2e2   :  { %1583 = vmatprep.subr.bf16.mxu0 %v1582_v15 }
 0x2e5   :  { %1585 = vmatpush1.bf16.msra.mxu0 %v1584_v22 }
 0x2e6   :  { %1587 = vmatprep.subr.bf16.mxu0 %v1586_v23 }
 0x383   :  { %v577_v26 = vpop.f32.mrb[8].mxu0 }
 0x384   :  { %v579_v27 = vpop.f32.mrb[9].mxu0  ;;  %v596_v29 = vmax.f32 %v577_v26, 0.0 }
 0x385   :  { %v581_v28 = vpop.f32.mrb[10].mxu0  ;;  %v597_v34 = vmax.f32 %v579_v27, 0.0 }
 0x386   :  { %v598_v32 = vmax.f32 %v581_v28, 0.0  ;;  %v583_v33 = vpop.f32.mrb[11].mxu0 }
 0x387   :  { %v599_v35 = vmax.f32 %v583_v33, 0.0 }
 0x388   :  { %v604_v38 = vpack.c.bf16 %v598_v32, %v596_v29 }
 0x389   :  { %v605_v39 = vpack.c.bf16 %v599_v35, %v597_v34 }
 0x38b   :  { %v587_v40 = vpop.f32.mrb[12].mxu0  ;;  %832 = vmatprep.mubr.bf16.mxu1 %v605_v39 }
 0x38c   :  { %v589_v41 = vpop.f32.mrb[13].mxu0  ;;  %833 = vmatmul.mubr.bf16.vlgmr.msra.gmra.mrb[8].mxu1 %v604_v38  ;;  %v600_v45 = vmax.f32 %v587_v40, 0.0 }
 0x38d   :  { %v591_v44 = vpop.f32.mrb[14].mxu0  ;;  %1597 = vmatpush1.bf16.msra.mxu1 %v2127_v0  ;;  %v601_v50 = vmax.f32 %v589_v41, 0.0  ;;  %v949_v0 = vld [vmem:[%s2524_s5 + $0x1c0] sm:$0xff] }
 0x38e   :  { %v602_v46 = vmax.f32 %v591_v44, 0.0  ;;  %v593_v47 = vpop.f32.mrb[15].mxu0  ;;  %1599 = vmatprep.subr.bf16.mxu1 %v2129_v2  ;;  %v951_v2 = vld [vmem:[%s2524_s5 + $0x1d0] sm:$0xff] }
 0x38f   :  { %v603_v51 = vmax.f32 %v593_v47, 0.0 }
 0x390   :  { %v606_v52 = vpack.c.bf16 %v602_v46, %v600_v45 }
 0x391   :  { %v607_v53 = vpack.c.bf16 %v603_v51, %v601_v50  ;;  %1601 = vmatpush1.bf16.msra.mxu1 %v2144_v7  ;;  %v1588_v7 = vpack.c.bf16 %v951_v2, %v949_v0 }
 0x392   :  { %1603 = vmatprep.subr.bf16.mxu1 %v2147_v8  ;;  %v954_v8 = vld [vmem:[%s2524_s5 + $0x1e8] sm:$0xff] }
 0x393   :  { %842 = vmatprep.mubr.bf16.mxu1 %v607_v53  ;;  %1589 = vmatpush1.bf16.msra.mxu0 %v1588_v7 }
 0x394   :  { %843 = vmatmul.mubr.bf16.gmra.mrb[12].mxu1 %v606_v52 }
 0x395   :  { %1605 = vmatpush1.bf16.msra.mxu1 %v2162_v13  ;;  %v956_v13 = vld [vmem:[%s2524_s5 + $0x1f8] sm:$0xff] }
 0x396   :  { %1607 = vmatprep.subr.bf16.mxu1 %v2165_v14  ;;  %v1590_v14 = vpack.c.bf16 %v956_v13, %v954_v8  ;;  %v1782_v8 = vld [vmem:[%s2526_s6 + $0x8] sm:$0xff]   ;;  %v1783_v13 = vld [vmem:[%s2526_s6 + $0x50] sm:$0xff]  }
 0x398   :  { %1591 = vmatprep.subr.bf16.mxu0 %v1590_v14 }
 0x399   :  { %1609 = vmatpush1.bf16.msra.mxu1 %v2180_v18  ;;  %v953_v18 = vld [vmem:[%s2524_s5 + $0x1e0] sm:$0xff] }
 0x39a   :  { %1611 = vmatprep.subr.bf16.mxu1 %v2183_v19  ;;  %v955_v19 = vld [vmem:[%s2524_s5 + $0x1f0] sm:$0xff] }
 0x39d   :  { %1613 = vmatpush1.bf16.msra.mxu1 %v2198_v24  ;;  %v1592_v24 = vpack.c.bf16 %v955_v19, %v953_v18  ;;  %v1785_v18 = vld [vmem:[%s2526_s6 + $0x58] sm:$0xff]  }
 0x39e   :  { %1615 = vmatprep.subr.bf16.mxu1 %v2201_v25  ;;  %v867_v25 = vlaneseq  ;;  %v1786_v19 = vld [vmem:[%s2526_s6 + $0x18] sm:$0xff]  }
 0x39f   :  { %1593 = vmatpush1.bf16.msra.mxu0 %v1592_v24 }
 0x3a0   :  { %1502 = vmatprep.subr.bf16.mxu0 %v1779_v20 }
 0x3a1   :  { %1617 = vmatpush1.bf16.msra.mxu1 %v2216_v30  ;;  %v868_v30 = vshrl.u32 %v867_v25, 7  ;;  %v1788_v25 = vld [vmem:[%s2526_s6 + $0x20] sm:$0xff]  }
 0x3a2   :  { %1619 = vmatprep.subr.bf16.mxu1 %v2219_v31 }
 0x3a3   :  { %v2397_v31 = vsub.s32 0, %v868_v30 }
 0x3a5   :  { %1621 = vmatpush1.bf16.msra.mxu1 %v2234_v36  ;;  %v853_v36 = vld [vmem:[%s2525_s7] ss:$4 sm:$0x3] }
 0x3a6   :  { %1623 = vmatprep.subr.bf16.mxu1 %v2237_v37  ;;  %v2402_v37 = vsub.s32 1, %v868_v30  ;;  %v1789_v30 = vld [vmem:[%s2526_s6 + $0x68] sm:$0xff]  }
 0x3a9   :  { %1625 = vmatpush1.bf16.msra.mxu1 %v2252_v42  ;;  %v870_v42 = vrot.slane %v853_v36, %v2397_v31 }
 0x3aa   :  { %1627 = vmatprep.subr.bf16.mxu1 %v2255_v43  ;;  %v874_v43 = vrot.slane %v853_v36, %v2402_v37  ;;  %v1790_v36 = vld [vmem:[%s2526_s6 + $0x28] sm:$0xff]  }
 0x3ad   :  { %1629 = vmatpush1.bf16.msra.mxu1 %v2270_v48 }
 0x3ae   :  { %1631 = vmatprep.subr.bf16.mxu1 %v2273_v49 }
 0x3b1   :  { %1633 = vmatpush1.bf16.msra.mxu1 %v2288_v54 }
 0x3b2   :  { %1635 = vmatprep.subr.bf16.mxu1 %v2291_v55 }
 0x3b5   :  { %1637 = vmatpush1.bf16.msra.mxu1 %v2306_v60 }
 0x3b6   :  { %1639 = vmatprep.subr.bf16.mxu1 %v2309_v61 }
 0x3b9   :  { %1641 = vmatpush1.bf16.msra.mxu1 %v2324_v5 }
 0x3ba   :  { %1643 = vmatprep.subr.bf16.mxu1 %v2327_v6 }
 0x3bd   :  { %1645 = vmatpush1.bf16.msra.mxu1 %v1580_v1 }
 0x3be   :  { %1647 = vmatprep.subr.bf16.mxu1 %v1582_v15 }
 0x3c1   :  { %1649 = vmatpush1.bf16.msra.mxu1 %v1584_v22 }
 0x3c2   :  { %1651 = vmatprep.subr.bf16.mxu1 %v1586_v23 }
 0x3c5   :  { %1653 = vmatpush1.bf16.msra.mxu1 %v1588_v7  ;;  %v1781_v7 = vld [vmem:[%s2526_s6 + $0x48] sm:$0xff]  }
 0x3c6   :  { %1655 = vmatprep.subr.bf16.mxu1 %v1590_v14  ;;  %v1784_v14 = vld [vmem:[%s2526_s6 + $0x10] sm:$0xff]  }
 0x3c9   :  { %1657 = vmatpush1.bf16.msra.mxu1 %v1592_v24  ;;  %v1787_v24 = vld [vmem:[%s2526_s6 + $0x60] sm:$0xff]  }
 0x45f   :  { %v834_v48 = vpop.f32.mrb[8].mxu1 }
 0x460   :  { %v877_v49 = vadd.f32 %v870_v42, %v834_v48  ;;  %v836_v54 = vpop.f32.mrb[9].mxu1  ;;  %v1793_v48 = vld [vmem:[%s2526_s6 + $0x78] sm:$0xff]  }
 0x461   :  { %v878_v55 = vadd.f32 %v874_v43, %v836_v54  ;;  %v838_v56 = vpop.f32.mrb[10].mxu1 }
 0x462   :  { %v840_v57 = vpop.f32.mrb[11].mxu1  ;;  %v885_v60 = vmax.f32 %v877_v49, 0.0  ;;  %v879_v61 = vadd.f32 %v870_v42, %v838_v56  ;;  %v1794_v49 = vld [vmem:[%s2526_s6 + $0x38] sm:$0xff]  }
 0x463   :  { %v886_v58 = vmax.f32 %v878_v55, 0.0  ;;  %v880_v59 = vadd.f32 %v874_v43, %v840_v57 }
 0x464   :  { %v887_v3 = vmax.f32 %v879_v61, 0.0 }
 0x465   :  { %v888_v62 = vmax.f32 %v880_v59, 0.0  ;;  %1021 = vmatprep.mubr.f32.mxu0 %v886_v58 }
 0x466   :  { %1022 = vmatmul.mubr.f32.vlgmr.msra.gmra.mrb[16].mxu0 %v885_v60 }
 0x467   :  { %v844_v63 = vpop.f32.mrb[12].mxu1  ;;  %1027 = vmatprep.mubr.f32.mxu0 %v888_v62  ;;  %1503 = vmatpush3.bf16.msra.mxu0 %v1780_v21 }
 0x468   :  { %v881_v4 = vadd.f32 %v870_v42, %v844_v63  ;;  %v846_v5 = vpop.f32.mrb[13].mxu1  ;;  %1504 = vmatprep.subr.bf16.mxu0 %v1781_v7 }
 0x469   :  { %v882_v6 = vadd.f32 %v874_v43, %v846_v5  ;;  %v848_v9 = vpop.f32.mrb[14].mxu1  ;;  %v1483_v5 = vld [vmem:[%s2525_s7 + $0x1] ss:$4 sm:$0x3] }
 0x46a   :  { %v850_v10 = vpop.f32.mrb[15].mxu1  ;;  %1028 = vmatmul.mubr.f32.gmra.mrb[18].mxu0 %v887_v3  ;;  %v889_v1 = vmax.f32 %v881_v4, 0.0  ;;  %v883_v15 = vadd.f32 %v870_v42, %v848_v9  ;;  %v1791_v42 = vld [vmem:[%s2526_s6 + $0x70] sm:$0xff]   ;;  %v1175_v21 = vrot.slane %v1483_v5, %v2402_v37 }
 0x46b   :  { %v890_v11 = vmax.f32 %v882_v6, 0.0  ;;  %v884_v12 = vadd.f32 %v874_v43, %v850_v10  ;;  %1505 = vmatpush3.bf16.msra.mxu0 %v1782_v8  ;;  %v1792_v43 = vld [vmem:[%s2526_s6 + $0x30] sm:$0xff]  }
 0x46c   :  { %v891_v17 = vmax.f32 %v883_v15, 0.0  ;;  %1506 = vmatprep.subr.bf16.mxu0 %v1783_v13 }
 0x46d   :  { %v892_v16 = vmax.f32 %v884_v12, 0.0  ;;  %1033 = vmatprep.mubr.f32.mxu0 %v890_v11 }
 0x46e   :  { %1034 = vmatmul.mubr.f32.gmra.mrb[20].mxu0 %v889_v1 }
 0x46f   :  { %1039 = vmatprep.mubr.f32.mxu0 %v892_v16  ;;  %1507 = vmatpush3.bf16.msra.mxu0 %v1784_v14 }
 0x470   :  { %1508 = vmatprep.subr.bf16.mxu0 %v1785_v18 }
 0x472   :  { %1040 = vmatmul.mubr.f32.gmra.mrb[22].mxu0 %v891_v17 }
 0x473   :  { %1509 = vmatpush3.bf16.msra.mxu0 %v1786_v19 }
 0x474   :  { %1510 = vmatprep.subr.bf16.mxu0 %v1787_v24 }
 0x477   :  { %1511 = vmatpush3.bf16.msra.mxu0 %v1788_v25 }
 0x478   :  { %1512 = vmatprep.subr.bf16.mxu0 %v1789_v30 }
 0x47b   :  { %1513 = vmatpush3.bf16.msra.mxu0 %v1790_v36 }
 0x47c   :  { %1514 = vmatprep.subr.bf16.mxu0 %v1791_v42 }
 0x47f   :  { %1515 = vmatpush3.bf16.msra.mxu0 %v1792_v43 }
 0x480   :  { %1516 = vmatprep.subr.bf16.mxu0 %v1793_v48 }
 0x483   :  { %1517 = vmatpush3.bf16.msra.mxu0 %v1794_v49 }
 0x539   :  { %v1023_v22 = vpop.f32.mrb[16].mxu0 }
 0x53a   :  { %v2412_v23 = vsub.f32 %v885_v60, %v1023_v22  ;;  %v1025_v26 = vpop.f32.mrb[17].mxu0 }
 0x53b   :  { %v2414_v27 = vsub.f32 %v886_v58, %v1025_v26 }
 0x53c   :  { %v1054_v32 = vmul.f32 %v2412_v23, %v2412_v23 }
 0x53d   :  { %v1055_v28 = vmul.f32 %v2414_v27, %v2414_v27  ;;  %v1029_v29 = vpop.f32.mrb[18].mxu0 }
 0x53e   :  { %v2420_v33 = vsub.f32 %v887_v3, %v1029_v29  ;;  %v1031_v34 = vpop.f32.mrb[19].mxu0 }
 0x53f   :  { %v2422_v35 = vsub.f32 %v888_v62, %v1031_v34  ;;  %1126 = vmatprep.mubr.f32.mxu1 %v1055_v28 }
 0x540   :  { %1127 = vmatmul.mubr.f32.vlgmr.msra.gmra.mrb[24].mxu1 %v1054_v32  ;;  %v1056_v40 = vmul.f32 %v2420_v33, %v2420_v33 }
 0x541   :  { %v1057_v38 = vmul.f32 %v2422_v35, %v2422_v35  ;;  %v1035_v39 = vpop.f32.mrb[20].mxu0 }
 0x542   :  { %v2428_v41 = vsub.f32 %v889_v1, %v1035_v39  ;;  %v1037_v44 = vpop.f32.mrb[21].mxu0  ;;  %v1171_v1 = vrot.slane %v1483_v5, %v2397_v31 }
 0x543   :  { %v2430_v45 = vsub.f32 %v890_v11, %v1037_v44  ;;  %1132 = vmatprep.mubr.f32.mxu1 %v1057_v38 }
 0x544   :  { %1133 = vmatmul.mubr.f32.gmra.mrb[26].mxu1 %v1056_v40  ;;  %v1058_v50 = vmul.f32 %v2428_v41, %v2428_v41 }
 0x545   :  { %v1059_v46 = vmul.f32 %v2430_v45, %v2430_v45  ;;  %v1041_v47 = vpop.f32.mrb[22].mxu0 }
 0x546   :  { %v2436_v51 = vsub.f32 %v891_v17, %v1041_v47  ;;  %v1043_v52 = vpop.f32.mrb[23].mxu0  ;;  %v1484_v17 = vld [vmem:[%s2525_s7 + $0x2] ss:$4 sm:$0x3] }
 0x547   :  { %v2438_v53 = vsub.f32 %v892_v16, %v1043_v52  ;;  %1138 = vmatprep.mubr.f32.mxu1 %v1059_v46  ;;  %v1190_v32 = vrot.slane %v1484_v17, %v2397_v31  ;;  %v1194_v38 = vrot.slane %v1484_v17, %v2402_v37 }
 0x548   :  { %1139 = vmatmul.mubr.f32.gmra.mrb[28].mxu1 %v1058_v50  ;;  %v1060_v2 = vmul.f32 %v2436_v51, %v2436_v51 }
 0x549   :  { %v1061_v0 = vmul.f32 %v2438_v53, %v2438_v53 }
 0x54b   :  { %1144 = vmatprep.mubr.f32.mxu1 %v1061_v0 }
 0x54c   :  { %1145 = vmatmul.mubr.f32.gmra.mrb[30].mxu1 %v1060_v2 }
 0x613   :  { %v1128_v54 = vpop.f32.mrb[24].mxu1 }
 0x614   :  { %v1129_v55 = vadd.f32 1e-05, %v1128_v54  ;;  %v1130_v56 = vpop.f32.mrb[25].mxu1 }
 0x615   :  { %v1131_v57 = vadd.f32 1e-05, %v1130_v56 }
 0x616   :  { %1795 = vrsqrt.f32 %v1129_v55 }
 0x617   :  { %1797 = vrsqrt.f32 %v1131_v57  ;;  %v1134_v58 = vpop.f32.mrb[26].mxu1 }
 0x618   :  { %v1135_v59 = vadd.f32 1e-05, %v1134_v58  ;;  %v1136_v60 = vpop.f32.mrb[27].mxu1 }
 0x619   :  { %v1137_v61 = vadd.f32 1e-05, %v1136_v60 }
 0x61a   :  { %1799 = vrsqrt.f32 %v1135_v59 }
 0x61b   :  { %1801 = vrsqrt.f32 %v1137_v61  ;;  %v1140_v62 = vpop.f32.mrb[28].mxu1 }
 0x61c   :  { %v1141_v63 = vadd.f32 1e-05, %v1140_v62  ;;  %v1142_v3 = vpop.f32.mrb[29].mxu1 }
 0x61d   :  { %v1143_v4 = vadd.f32 1e-05, %v1142_v3 }
 0x61e   :  { %1803 = vrsqrt.f32 %v1141_v63 }
 0x61f   :  { %1805 = vrsqrt.f32 %v1143_v4  ;;  %v1146_v6 = vpop.f32.mrb[30].mxu1 }
 0x620   :  { %v1796_v9 = vpop.eup %1795  ;;  %v1147_v10 = vadd.f32 1e-05, %v1146_v6  ;;  %v1148_v11 = vpop.f32.mrb[31].mxu1 }
 0x621   :  { %v1798_v12 = vpop.eup %1797  ;;  %v1159_v15 = vmul.f32 %v1796_v9, %v2412_v23  ;;  %v1149_v16 = vadd.f32 1e-05, %v1148_v11 }
 0x622   :  { %1807 = vrsqrt.f32 %v1147_v10  ;;  %v1160_v20 = vmul.f32 %v1798_v12, %v2414_v27 }
 0x623   :  { %1809 = vrsqrt.f32 %v1149_v16  ;;  %v1178_v28 = vmul.f32 %v1171_v1, %v1159_v15 }
 0x624   :  { %v1800_v22 = vpop.eup %1799  ;;  %v1179_v34 = vmul.f32 %v1175_v21, %v1160_v20 }
 0x625   :  { %v1802_v26 = vpop.eup %1801  ;;  %v1161_v29 = vmul.f32 %v1800_v22, %v2420_v33  ;;  %v1197_v27 = vadd.f32 %v1190_v32, %v1178_v28 }
 0x626   :  { %v1162_v23 = vmul.f32 %v1802_v26, %v2422_v35  ;;  %v1198_v52 = vadd.f32 %v1194_v38, %v1179_v34 }
 0x627   :  { %v1180_v39 = vmul.f32 %v1171_v1, %v1161_v29 }
 0x628   :  { %v1804_v40 = vpop.eup %1803  ;;  %v1181_v44 = vmul.f32 %v1175_v21, %v1162_v23 }
 0x629   :  { %v1806_v46 = vpop.eup %1805  ;;  %v1199_v47 = vadd.f32 %v1190_v32, %v1180_v39  ;;  %v1163_v50 = vmul.f32 %v1804_v40, %v2428_v41 }
 0x62a   :  { %v1200_v0 = vadd.f32 %v1194_v38, %v1181_v44  ;;  %v1164_v2 = vmul.f32 %v1806_v46, %v2430_v45 }
 0x62b   :  { %v1206_v33 = vpack.c.bf16 %v1199_v47, %v1197_v27  ;;  %v1182_v13 = vmul.f32 %v1171_v1, %v1163_v50 }
 0x62c   :  { %v1808_v7 = vpop.eup %1807  ;;  %v1207_v31 = vpack.c.bf16 %v1200_v0, %v1198_v52  ;;  %v1183_v14 = vmul.f32 %v1175_v21, %v1164_v2 }
 0x62d   :  { %v1810_v8 = vpop.eup %1809  ;;  %v1165_v35 = vmul.f32 %v1808_v7, %v2436_v51  ;;  %v1201_v24 = vadd.f32 %v1190_v32, %v1182_v13  ;;  %v1485_v51 = vld [vmem:[%s2525_s7 + $0x3] ss:$0 sm:$0xff] }
 0x62e   :  { %1374 = vmatprep.mubr.bf16.mxu0 %v1207_v31  ;;  %v1166_v37 = vmul.f32 %v1810_v8, %v2438_v53  ;;  %v1202_v25 = vadd.f32 %v1194_v38, %v1183_v14 }
 0x62f   :  { %1375 = vmatmul.mubr.bf16.vlgmr.msra.gmra.mrb[24].mxu0 %v1206_v33  ;;  %v1184_v18 = vmul.f32 %v1171_v1, %v1165_v35 }
 0x630   :  { %v1185_v19 = vmul.f32 %v1175_v21, %v1166_v37 }
 0x631   :  { %v1203_v41 = vadd.f32 %v1190_v32, %v1184_v18 }
 0x632   :  { %v1204_v30 = vadd.f32 %v1194_v38, %v1185_v19 }
 0x633   :  { %v1208_v36 = vpack.c.bf16 %v1203_v41, %v1201_v24 }
 0x634   :  { %v1209_v45 = vpack.c.bf16 %v1204_v30, %v1202_v25 }
 0x636   :  { %1382 = vmatprep.mubr.bf16.mxu0 %v1209_v45 }
 0x637   :  { %1383 = vmatmul.mubr.bf16.gmra.mrb[28].mxu0 %v1208_v36 }
 0x702   :  { %v1518_v42 = vpop.f32.mrb[24].mxu0 }
 0x703   :  { %v1519_v43 = vpop.f32.mrb[25].mxu0 }
 0x704   :  { %v1520_v48 = vadd.f32 %v1519_v43, %v1518_v42  ;;  %v1521_v53 = vpop.f32.mrb[26].mxu0 }
 0x705   :  { %v1522_v49 = vpop.f32.mrb[27].mxu0 }
 0x706   :  { %v1377_v54 = vadd.f32 %v1520_v48, %v1485_v51  ;;  %v1523_v55 = vadd.f32 %v1522_v49, %v1521_v53 }
 0x708   :  { %1391 = vst [vmem:[%s2527_s8] sm:$0xff] %v1377_v54  ;;  %v1380_v56 = vadd.f32 %v1523_v55, %v1485_v51 }
 0x70a   :  { %1392 = vst [vmem:[%s2527_s8 + $0x8] sm:$0xff] %v1380_v56  ;;  %v1524_v57 = vpop.f32.mrb[28].mxu0 }
 0x70b   :  { %v1525_v58 = vpop.f32.mrb[29].mxu0 }
 0x70c   :  { %v1526_v59 = vadd.f32 %v1525_v58, %v1524_v57  ;;  %v1527_v60 = vpop.f32.mrb[30].mxu0 }
 0x70d   :  { %v1528_v61 = vpop.f32.mrb[31].mxu0 }
 0x70e   :  { %v1385_v62 = vadd.f32 %v1526_v59, %v1485_v51  ;;  %v1529_v63 = vadd.f32 %v1528_v61, %v1527_v60 }
 0x710   :  { %1393 = vst [vmem:[%s2527_s8 + $0x10] sm:$0xff] %v1385_v62  ;;  %v1388_v3 = vadd.f32 %v1529_v63, %v1485_v51 }
 0x712   :  { %1394 = vst [vmem:[%s2527_s8 + $0x18] sm:$0xff] %v1388_v3 }

</bundles_post_ra>
